<compile_context>
chip_gen: v7x
topology: tpu7x:2x2x1
jax: 0.10.0
libtpu: 0.0.40
codegen_flags: <defaults>
</compile_context>

<pallas_src>
import jax
import jax.numpy as jnp
from jax import lax
from jax.experimental import pallas as pl
from jax.experimental.pallas import tpu as pltpu


def _crf_logz_kernel(em_ref, lens_ref, expT_ref, cmax_ref, eos_ref, bos_ref,
                     out_ref, alphas_ref):
    """One (batch_tile, time_chunk) grid step of the CRF log-partition.

    Shapes (batch on the lane axis, labels on sublanes):
      em_ref   : (TC, L, BT) f32  emissions chunk
      lens_ref : (1, BT)     i32  valid sequence length per lane (0 for lane padding)
      expT_ref : (L, L)      f32  expT[c, p] = exp(trans[p, c] - colmax[c])
      cmax_ref : (L, 1)      f32  per-destination-label column max of trans
      eos_ref  : (L, 1)      f32  trans[:, EOS]
      bos_ref  : (L, 1)      f32  one-hot-at-BOS in log space (0 at BOS, -1e30 else)
    Scratch (carried across the time-chunk axis, re-initialized at tc == 0):
      alphas_ref: (L, BT) f32 forward log-alphas
    """
    TC, L, BT = em_ref.shape
    tc = pl.program_id(1)
    ntc = pl.num_programs(1)

    @pl.when(tc == 0)
    def _init():
        # alpha_{-1} = one-hot at BOS in log space; the first recursion step then
        # reproduces trans[BOS, :] + emissions[0] exactly (no peeled special case).
        alphas_ref[...] = jnp.broadcast_to(bos_ref[...], (L, BT))

    lens_v = lens_ref[...]                                     # (1, BT) i32
    expT = expT_ref[...]                                       # (L, L)
    cmax_b = jnp.broadcast_to(cmax_ref[...], (L, BT))          # hoisted lane-broadcast
    t_base = tc * TC

    # Forward recursion: logsumexp recast as an MXU matmul against exp(trans - colmax).
    def fwd_step(t, alphas):
        em_t = em_ref[t] + cmax_b                              # off the carry chain
        m_b = jnp.max(alphas, axis=0, keepdims=True)           # (1, BT)
        ea = jnp.exp(alphas - m_b)                             # (L, BT)
        s = jnp.dot(expT, ea, preferred_element_type=jnp.float32)   # (L, BT)
        new_alphas = em_t + m_b + jnp.log(s)
        valid = (t_base + t) < lens_v                          # (1, BT) bool
        return jnp.where(valid, new_alphas, alphas)

    alphas = lax.fori_loop(0, TC, fwd_step, alphas_ref[...], unroll=4)
    alphas_ref[...] = alphas

    @pl.when(tc == ntc - 1)
    def _finalize():
        end = alphas + eos_ref[...]                            # (L, BT)
        m_end = jnp.max(end, axis=0, keepdims=True)            # (1, BT)
        out_ref[...] = m_end + jnp.log(
            jnp.sum(jnp.exp(end - m_end), axis=0, keepdims=True))


def crf_nll(emissions, tags, mask, transitions, bos_tag_id, eos_tag_id,
            *, b_tile=256, t_chunk=256):
    """Pallas-accelerated CRF negative log-likelihood (batch_first semantics)."""
    B, T, L = emissions.shape
    f32 = jnp.float32
    trans = transitions.astype(f32)
    em = emissions.astype(f32)
    mask_f = mask.astype(f32)
    tags_i = tags.astype(jnp.int32)

    # ---- gold-path score: pure-JAX vectorized gathers (tiny vs. the recursion) ----
    lengths = jnp.sum(mask_f, axis=1).astype(jnp.int32)                  # (B,)
    last_tags = jnp.take_along_axis(tags_i, (lengths - 1)[:, None], axis=1)[:, 0]
    e_gold = jnp.take_along_axis(em, tags_i[..., None], axis=2)[..., 0]  # (B, T)
    t_gold = trans[tags_i[:, :-1], tags_i[:, 1:]]                        # (B, T-1)
    gold = (trans[bos_tag_id, tags_i[:, 0]] + e_gold[:, 0]
            + jnp.sum(mask_f[:, 1:] * (e_gold[:, 1:] + t_gold), axis=1)
            + trans[last_tags, eos_tag_id])                              # (B,)

    # ---- batch / time tiling ----
    n128 = -(-B // 128)                       # batch in units of 128 lanes
    bt = max(128, (min(b_tile, n128 * 128) // 128) * 128)
    if n128 >= 2:                             # keep >= 2 batch tiles (v7x: 2 TCs)
        bt = max(128, min(bt, 128 * (n128 // 2)))
    BP = -(-B // bt) * bt
    n_bt = BP // bt

    TC = max(1, min(t_chunk, T))
    TP = -(-T // TC) * TC
    n_tc = TP // TC

    # (T, L, B) layout: batch on lanes, labels on sublanes.
    em_t = jnp.transpose(em, (1, 2, 0))                                  # (T, L, B)
    em_p = jnp.pad(em_t, ((0, TP - T), (0, 0), (0, BP - B)))
    lens_p = jnp.pad(lengths, (0, BP - B))[None, :]                      # (1, BP) i32

    # Transition constants precomputed in the wrapper.
    colmax = jnp.max(trans, axis=0)                                      # (L,)
    exp_transT = jnp.exp(trans - colmax[None, :]).T                      # (L, L) [c, p]
    cmax_col = colmax[:, None]                                           # (L, 1)
    eos_col = trans[:, eos_tag_id][:, None]                              # (L, 1)
    bos_init = jnp.full((L, 1), -1e30, f32).at[bos_tag_id, 0].set(0.0)   # (L, 1)

    grid_spec = pltpu.PrefetchScalarGridSpec(
        num_scalar_prefetch=0,
        grid=(n_bt, n_tc),
        in_specs=[
            pl.BlockSpec((TC, L, bt), lambda bi, tc: (tc, 0, bi)),       # emissions
            pl.BlockSpec((1, bt), lambda bi, tc: (0, bi)),               # lengths
            pl.BlockSpec((L, L), lambda bi, tc: (0, 0)),                 # exp(trans).T
            pl.BlockSpec((L, 1), lambda bi, tc: (0, 0)),                 # colmax
            pl.BlockSpec((L, 1), lambda bi, tc: (0, 0)),                 # trans[:, EOS]
            pl.BlockSpec((L, 1), lambda bi, tc: (0, 0)),                 # BOS one-hot log
        ],
        out_specs=pl.BlockSpec((1, bt), lambda bi, tc: (0, bi)),
        scratch_shapes=[pltpu.VMEM((L, bt), f32)],                       # alphas carry
    )

    log_z = pl.pallas_call(
        _crf_logz_kernel,
        out_shape=jax.ShapeDtypeStruct((1, BP), f32),
        grid_spec=grid_spec,
        compiler_params=pltpu.CompilerParams(
            dimension_semantics=("parallel", "arbitrary"),
            allow_input_fusion=[True, False, False, False, False, False]),
    )(em_p, lens_p, exp_transT, cmax_col, eos_col, bos_init)

    log_z = log_z[0, :B]                                                 # (B,)
    return -jnp.sum(gold - log_z)


def crf_nll_reference(emissions, tags, mask, transitions, bos, eos):
    """Pure-JAX mirror of the PyTorch CRF.forward for validation."""
    B, T, L = emissions.shape
    bidx = jnp.arange(B)
    first_tags = tags[:, 0]
    last_idx = jnp.sum(mask, axis=1).astype(jnp.int32) - 1
    last_tags = jnp.take_along_axis(tags, last_idx[:, None], axis=1)[:, 0]

    scores = transitions[bos, first_tags] + emissions[bidx, 0, first_tags]
    for i in range(1, T):
        is_valid = mask[:, i]
        e = emissions[bidx, i, tags[:, i]]
        t = transitions[tags[:, i - 1], tags[:, i]]
        scores = scores + is_valid * (e + t)
    scores = scores + transitions[last_tags, eos]

    alphas = transitions[bos][None, :] + emissions[:, 0]
    for i in range(1, T):
        sc = alphas[:, :, None] + transitions[None, :, :] + emissions[:, i][:, None, :]
        new_alphas = jax.scipy.special.logsumexp(sc, axis=1)
        is_valid = mask[:, i][:, None]
        alphas = is_valid * new_alphas + (1.0 - is_valid) * alphas
    end = alphas + transitions[:, eos][None, :]
    log_z = jax.scipy.special.logsumexp(end, axis=1)
    return -jnp.sum(scores - log_z)


# TODO(synk): decode()/_viterbi_decode() backtracking returns variable-length
# Python lists; not expressible as a fixed-shape Pallas output, so only the
# forward() NLL path is implemented here.


if __name__ == "__main__":
    B, T, L = 2, 8, 8                 # batch, seq_len, nb_labels
    BOS, EOS = L - 2, L - 1           # bos_tag_id=6, eos_tag_id=7

    key = jax.random.PRNGKey(0)
    k_t, k_e, k_tag = jax.random.split(key, 3)

    # Deterministic parameter init matching CRF.__init__/init_weights.
    transitions = jax.random.uniform(k_t, (L, L), jnp.float32, -0.1, 0.1)
    transitions = transitions.at[:, BOS].set(-10000.0)
    transitions = transitions.at[EOS, :].set(-10000.0)

    emissions = jax.random.normal(k_e, (B, T, L), jnp.float32)
    tags = jax.random.randint(k_tag, (B, T), 0, L - 2).astype(jnp.int32)
    lengths = jnp.array([T, T - 3], dtype=jnp.int32)
    mask = (jnp.arange(T)[None, :] < lengths[:, None]).astype(jnp.float32)

    # t_chunk=4 exercises multiple time chunks with the scratch-carried alphas.
    nll = crf_nll(emissions, tags, mask, transitions, BOS, EOS, t_chunk=4)
    nll = jax.block_until_ready(nll)

    ref = crf_nll_reference(emissions, tags, mask, transitions, BOS, EOS)
    assert jnp.allclose(nll, ref, rtol=1e-4, atol=1e-3), (float(nll), float(ref))
    print("KERNEL_OK")
</pallas_src>

<mosaic_0001>
module attributes {stable_mosaic.version = 11 : i64} {
  func.func @_crf_logz_kernel(%arg0: i32, %arg1: i32, %arg2: memref<4x8x128xf32, #tpu.memory_space<vmem>>, %arg3: memref<1x128xi32, #tpu.memory_space<vmem>>, %arg4: memref<8x8xf32, #tpu.memory_space<vmem>>, %arg5: memref<8x1xf32, #tpu.memory_space<vmem>>, %arg6: memref<8x1xf32, #tpu.memory_space<vmem>>, %arg7: memref<8x1xf32, #tpu.memory_space<vmem>>, %arg8: memref<1x128xf32, #tpu.memory_space<vmem>>, %arg9: memref<8x128xf32, #tpu.memory_space<vmem>>) attributes {dimension_semantics = [#tpu.dimension_semantics<parallel>, #tpu.dimension_semantics<arbitrary>], iteration_bounds = array<i64: 1, 2>, scalar_prefetch = 0 : i64, scratch_operands = 1 : i64, tpu.core_type = #tpu.core_type<tc>, window_params = [{transform_indices = @transform_0, window_bounds = array<i64: 4, 8, 128>}, {transform_indices = @transform_1, window_bounds = array<i64: 1, 128>}, {pipeline_mode = #tpu.pipeline_mode<synchronous>, transform_indices = @transform_2, window_bounds = array<i64: 8, 8>}, {pipeline_mode = #tpu.pipeline_mode<synchronous>, transform_indices = @transform_3, window_bounds = array<i64: 8, 1>}, {pipeline_mode = #tpu.pipeline_mode<synchronous>, transform_indices = @transform_4, window_bounds = array<i64: 8, 1>}, {pipeline_mode = #tpu.pipeline_mode<synchronous>, transform_indices = @transform_5, window_bounds = array<i64: 8, 1>}, {transform_indices = @transform_6, window_bounds = array<i64: 1, 128>}]} {
    %c0_i32 = arith.constant 0 : i32
    %0 = arith.cmpi eq, %arg1, %c0_i32 : i32
    %1 = arith.extui %0 : i1 to i32
    %c0_i32_0 = arith.constant 0 : i32
    %2 = arith.cmpi ne, %1, %c0_i32_0 : i32
    scf.if %2 {
      %c0_29 = arith.constant 0 : index
      %c0_30 = arith.constant 0 : index
      %94 = vector.load %arg7[%c0_29, %c0_30] : memref<8x1xf32, #tpu.memory_space<vmem>>, vector<8x1xf32>
      %95 = vector.shape_cast %94 : vector<8x1xf32> to vector<8x1xf32>
      %96 = vector.broadcast %95 : vector<8x1xf32> to vector<8x128xf32>
      %c0_31 = arith.constant 0 : index
      %c0_32 = arith.constant 0 : index
      %97 = vector.load %arg9[%c0_31, %c0_32] : memref<8x128xf32, #tpu.memory_space<vmem>>, vector<8x128xf32>
      tpu.vector_store %arg9[%c0_31, %c0_32], %96 {strides = array<i32>} : memref<8x128xf32, #tpu.memory_space<vmem>>, vector<8x128xf32>,
    } else {
    }
    %c0 = arith.constant 0 : index
    %c0_1 = arith.constant 0 : index
    %3 = vector.load %arg3[%c0, %c0_1] : memref<1x128xi32, #tpu.memory_space<vmem>>, vector<1x128xi32>
    %c0_2 = arith.constant 0 : index
    %c0_3 = arith.constant 0 : index
    %4 = vector.load %arg4[%c0_2, %c0_3] : memref<8x8xf32, #tpu.memory_space<vmem>>, vector<8x8xf32>
    %c0_4 = arith.constant 0 : index
    %c0_5 = arith.constant 0 : index
    %5 = vector.load %arg5[%c0_4, %c0_5] : memref<8x1xf32, #tpu.memory_space<vmem>>, vector<8x1xf32>
    %6 = vector.shape_cast %5 : vector<8x1xf32> to vector<8x1xf32>
    %7 = vector.broadcast %6 : vector<8x1xf32> to vector<8x128xf32>
    %c4_i32 = arith.constant 4 : i32
    %8 = arith.muli %arg1, %c4_i32 : i32
    %c0_6 = arith.constant 0 : index
    %c0_7 = arith.constant 0 : index
    %9 = vector.load %arg9[%c0_6, %c0_7] : memref<8x128xf32, #tpu.memory_space<vmem>>, vector<8x128xf32>
    %c0_i32_8 = arith.constant 0 : i32
    %10 = arith.index_cast %c0_i32_8 : i32 to index
    %c0_9 = arith.constant 0 : index
    %c0_10 = arith.constant 0 : index
    %11 = vector.load %arg2[%10, %c0_9, %c0_10] : memref<4x8x128xf32, #tpu.memory_space<vmem>>, vector<1x8x128xf32>
    %12 = vector.shape_cast %11 : vector<1x8x128xf32> to vector<8x128xf32>
    %13 = arith.addf %12, %7 : vector<8x128xf32>
    %cst = arith.constant dense<0xFF800000> : vector<128xf32>
    %14 = vector.multi_reduction <maximumf>, %9, %cst [0] : vector<8x128xf32> to vector<128xf32>
    %15 = vector.shape_cast %14 : vector<128xf32> to vector<1x128xf32>
    %16 = vector.broadcast %15 : vector<1x128xf32> to vector<8x128xf32>
    %17 = arith.subf %9, %16 : vector<8x128xf32>
    %18 = math.exp %17 : vector<8x128xf32>
    %cst_11 = arith.constant dense<0.000000e+00> : vector<8x128xf32>
    %19 = tpu.matmul %4, %18, %cst_11 {dimension_numbers = #tpu.dot_dimension_numbers<[1], [0], [0], [1], [0, 0, 1, 1], [], []>} : vector<8x8xf32>, vector<8x128xf32>, vector<8x128xf32> -> vector<8x128xf32>
    %20 = vector.broadcast %15 : vector<1x128xf32> to vector<8x128xf32>
    %21 = arith.addf %13, %20 : vector<8x128xf32>
    %22 = math.log %19 : vector<8x128xf32>
    %23 = arith.addf %21, %22 : vector<8x128xf32>
    %24 = arith.addi %8, %c0_i32_8 : i32
    %25 = vector.broadcast %24 : i32 to vector<1x128xi32>
    %26 = arith.cmpi slt, %25, %3 : vector<1x128xi32>
    %27 = vector.shape_cast %26 : vector<1x128xi1> to vector<1x128xi1>
    %28 = vector.broadcast %27 : vector<1x128xi1> to vector<8x128xi1>
    %29 = arith.select %28, %23, %9 : vector<8x128xi1>, vector<8x128xf32>
    %c1_i32 = arith.constant 1 : i32
    %30 = arith.index_cast %c1_i32 : i32 to index
    %c0_12 = arith.constant 0 : index
    %c0_13 = arith.constant 0 : index
    %31 = vector.load %arg2[%30, %c0_12, %c0_13] : memref<4x8x128xf32, #tpu.memory_space<vmem>>, vector<1x8x128xf32>
    %32 = vector.shape_cast %31 : vector<1x8x128xf32> to vector<8x128xf32>
    %33 = arith.addf %32, %7 : vector<8x128xf32>
    %cst_14 = arith.constant dense<0xFF800000> : vector<128xf32>
    %34 = vector.multi_reduction <maximumf>, %29, %cst_14 [0] : vector<8x128xf32> to vector<128xf32>
    %35 = vector.shape_cast %34 : vector<128xf32> to vector<1x128xf32>
    %36 = vector.broadcast %35 : vector<1x128xf32> to vector<8x128xf32>
    %37 = arith.subf %29, %36 : vector<8x128xf32>
    %38 = math.exp %37 : vector<8x128xf32>
    %cst_15 = arith.constant dense<0.000000e+00> : vector<8x128xf32>
    %39 = tpu.matmul %4, %38, %cst_15 {dimension_numbers = #tpu.dot_dimension_numbers<[1], [0], [0], [1], [0, 0, 1, 1], [], []>} : vector<8x8xf32>, vector<8x128xf32>, vector<8x128xf32> -> vector<8x128xf32>
    %40 = vector.broadcast %35 : vector<1x128xf32> to vector<8x128xf32>
    %41 = arith.addf %33, %40 : vector<8x128xf32>
    %42 = math.log %39 : vector<8x128xf32>
    %43 = arith.addf %41, %42 : vector<8x128xf32>
    %44 = arith.addi %8, %c1_i32 : i32
    %45 = vector.broadcast %44 : i32 to vector<1x128xi32>
    %46 = arith.cmpi slt, %45, %3 : vector<1x128xi32>
    %47 = vector.shape_cast %46 : vector<1x128xi1> to vector<1x128xi1>
    %48 = vector.broadcast %47 : vector<1x128xi1> to vector<8x128xi1>
    %49 = arith.select %48, %43, %29 : vector<8x128xi1>, vector<8x128xf32>
    %c2_i32 = arith.constant 2 : i32
    %50 = arith.index_cast %c2_i32 : i32 to index
    %c0_16 = arith.constant 0 : index
    %c0_17 = arith.constant 0 : index
    %51 = vector.load %arg2[%50, %c0_16, %c0_17] : memref<4x8x128xf32, #tpu.memory_space<vmem>>, vector<1x8x128xf32>
    %52 = vector.shape_cast %51 : vector<1x8x128xf32> to vector<8x128xf32>
    %53 = arith.addf %52, %7 : vector<8x128xf32>
    %cst_18 = arith.constant dense<0xFF800000> : vector<128xf32>
    %54 = vector.multi_reduction <maximumf>, %49, %cst_18 [0] : vector<8x128xf32> to vector<128xf32>
    %55 = vector.shape_cast %54 : vector<128xf32> to vector<1x128xf32>
    %56 = vector.broadcast %55 : vector<1x128xf32> to vector<8x128xf32>
    %57 = arith.subf %49, %56 : vector<8x128xf32>
    %58 = math.exp %57 : vector<8x128xf32>
    %cst_19 = arith.constant dense<0.000000e+00> : vector<8x128xf32>
    %59 = tpu.matmul %4, %58, %cst_19 {dimension_numbers = #tpu.dot_dimension_numbers<[1], [0], [0], [1], [0, 0, 1, 1], [], []>} : vector<8x8xf32>, vector<8x128xf32>, vector<8x128xf32> -> vector<8x128xf32>
    %60 = vector.broadcast %55 : vector<1x128xf32> to vector<8x128xf32>
    %61 = arith.addf %53, %60 : vector<8x128xf32>
    %62 = math.log %59 : vector<8x128xf32>
    %63 = arith.addf %61, %62 : vector<8x128xf32>
    %64 = arith.addi %8, %c2_i32 : i32
    %65 = vector.broadcast %64 : i32 to vector<1x128xi32>
    %66 = arith.cmpi slt, %65, %3 : vector<1x128xi32>
    %67 = vector.shape_cast %66 : vector<1x128xi1> to vector<1x128xi1>
    %68 = vector.broadcast %67 : vector<1x128xi1> to vector<8x128xi1>
    %69 = arith.select %68, %63, %49 : vector<8x128xi1>, vector<8x128xf32>
    %c3_i32 = arith.constant 3 : i32
    %70 = arith.index_cast %c3_i32 : i32 to index
    %c0_20 = arith.constant 0 : index
    %c0_21 = arith.constant 0 : index
    %71 = vector.load %arg2[%70, %c0_20, %c0_21] : memref<4x8x128xf32, #tpu.memory_space<vmem>>, vector<1x8x128xf32>
    %72 = vector.shape_cast %71 : vector<1x8x128xf32> to vector<8x128xf32>
    %73 = arith.addf %72, %7 : vector<8x128xf32>
    %cst_22 = arith.constant dense<0xFF800000> : vector<128xf32>
    %74 = vector.multi_reduction <maximumf>, %69, %cst_22 [0] : vector<8x128xf32> to vector<128xf32>
    %75 = vector.shape_cast %74 : vector<128xf32> to vector<1x128xf32>
    %76 = vector.broadcast %75 : vector<1x128xf32> to vector<8x128xf32>
    %77 = arith.subf %69, %76 : vector<8x128xf32>
    %78 = math.exp %77 : vector<8x128xf32>
    %cst_23 = arith.constant dense<0.000000e+00> : vector<8x128xf32>
    %79 = tpu.matmul %4, %78, %cst_23 {dimension_numbers = #tpu.dot_dimension_numbers<[1], [0], [0], [1], [0, 0, 1, 1], [], []>} : vector<8x8xf32>, vector<8x128xf32>, vector<8x128xf32> -> vector<8x128xf32>
    %80 = vector.broadcast %75 : vector<1x128xf32> to vector<8x128xf32>
    %81 = arith.addf %73, %80 : vector<8x128xf32>
    %82 = math.log %79 : vector<8x128xf32>
    %83 = arith.addf %81, %82 : vector<8x128xf32>
    %84 = arith.addi %8, %c3_i32 : i32
    %85 = vector.broadcast %84 : i32 to vector<1x128xi32>
    %86 = arith.cmpi slt, %85, %3 : vector<1x128xi32>
    %87 = vector.shape_cast %86 : vector<1x128xi1> to vector<1x128xi1>
    %88 = vector.broadcast %87 : vector<1x128xi1> to vector<8x128xi1>
    %89 = arith.select %88, %83, %69 : vector<8x128xi1>, vector<8x128xf32>
    %c4_i32_24 = arith.constant 4 : i32
    %c0_25 = arith.constant 0 : index
    %c0_26 = arith.constant 0 : index
    %90 = vector.load %arg9[%c0_25, %c0_26] : memref<8x128xf32, #tpu.memory_space<vmem>>, vector<8x128xf32>
    tpu.vector_store %arg9[%c0_25, %c0_26], %89 {strides = array<i32>} : memref<8x128xf32, #tpu.memory_space<vmem>>, vector<8x128xf32>,
    %c1_i32_27 = arith.constant 1 : i32
    %91 = arith.cmpi eq, %arg1, %c1_i32_27 : i32
    %92 = arith.extui %91 : i1 to i32
    %c0_i32_28 = arith.constant 0 : i32
    %93 = arith.cmpi ne, %92, %c0_i32_28 : i32
    scf.if %93 {
      %c0_29 = arith.constant 0 : index
      %c0_30 = arith.constant 0 : index
      %94 = vector.load %arg6[%c0_29, %c0_30] : memref<8x1xf32, #tpu.memory_space<vmem>>, vector<8x1xf32>
      %95 = vector.broadcast %94 : vector<8x1xf32> to vector<8x128xf32>
      %96 = arith.addf %89, %95 : vector<8x128xf32>
      %cst_31 = arith.constant dense<0xFF800000> : vector<128xf32>
      %97 = vector.multi_reduction <maximumf>, %96, %cst_31 [0] : vector<8x128xf32> to vector<128xf32>
      %98 = vector.shape_cast %97 : vector<128xf32> to vector<1x128xf32>
      %99 = vector.broadcast %98 : vector<1x128xf32> to vector<8x128xf32>
      %100 = arith.subf %96, %99 : vector<8x128xf32>
      %101 = math.exp %100 : vector<8x128xf32>
      %cst_32 = arith.constant dense<0.000000e+00> : vector<128xf32>
      %102 = vector.multi_reduction <add>, %101, %cst_32 [0] : vector<8x128xf32> to vector<128xf32>
      %103 = vector.shape_cast %102 : vector<128xf32> to vector<1x128xf32>
      %104 = math.log %103 : vector<1x128xf32>
      %105 = arith.addf %98, %104 : vector<1x128xf32>
      %c0_33 = arith.constant 0 : index
      %c0_34 = arith.constant 0 : index
      %106 = vector.load %arg8[%c0_33, %c0_34] : memref<1x128xf32, #tpu.memory_space<vmem>>, vector<1x128xf32>
      tpu.vector_store %arg8[%c0_33, %c0_34], %105 {strides = array<i32>} : memref<1x128xf32, #tpu.memory_space<vmem>>, vector<1x128xf32>,
    } else {
    }
    return
  }
  func.func @transform_0(%arg0: i32, %arg1: i32) -> (i32, i32, i32) {
    %c0_i32 = arith.constant 0 : i32
    %c0_i32_0 = arith.constant 0 : i32
    return %arg1, %c0_i32, %arg0 : i32, i32, i32
  }
  func.func @transform_1(%arg0: i32, %arg1: i32) -> (i32, i32) {
    %c0_i32 = arith.constant 0 : i32
    %c0_i32_0 = arith.constant 0 : i32
    return %c0_i32, %arg0 : i32, i32
  }
  func.func @transform_2(%arg0: i32, %arg1: i32) -> (i32, i32) {
    %c0_i32 = arith.constant 0 : i32
    %c0_i32_0 = arith.constant 0 : i32
    %c0_i32_1 = arith.constant 0 : i32
    return %c0_i32, %c0_i32_0 : i32, i32
  }
  func.func @transform_3(%arg0: i32, %arg1: i32) -> (i32, i32) {
    %c0_i32 = arith.constant 0 : i32
    %c0_i32_0 = arith.constant 0 : i32
    %c0_i32_1 = arith.constant 0 : i32
    return %c0_i32, %c0_i32_0 : i32, i32
  }
  func.func @transform_4(%arg0: i32, %arg1: i32) -> (i32, i32) {
    %c0_i32 = arith.constant 0 : i32
    %c0_i32_0 = arith.constant 0 : i32
    %c0_i32_1 = arith.constant 0 : i32
    return %c0_i32, %c0_i32_0 : i32, i32
  }
  func.func @transform_5(%arg0: i32, %arg1: i32) -> (i32, i32) {
    %c0_i32 = arith.constant 0 : i32
    %c0_i32_0 = arith.constant 0 : i32
    %c0_i32_1 = arith.constant 0 : i32
    return %c0_i32, %c0_i32_0 : i32, i32
  }
  func.func @transform_6(%arg0: i32, %arg1: i32) -> (i32, i32) {
    %c0_i32 = arith.constant 0 : i32
    %c0_i32_0 = arith.constant 0 : i32
    return %c0_i32, %arg0 : i32, i32
  }
}

</mosaic_0001>

<bundles_post_ra>
// kernel: tpu_custom_call.1
= control target key start
LH: loop header
LB: loop body
LE: loop exit
PB: predicated region body
PF: predicated region fallthrough
CT: control target
= control target key end

     0   :  { %11 = vsyncpa [#allocation4], 0  ;;  %s1334_s0 = inlined_call_operand.hbm [shape: f32[8,8,128], index: 0, kind: input, shape index: {}]   ;;  %s1335_s1 = inlined_call_operand.vmem [shape: s32[1,128], index: 1, kind: input, shape index: {}]   ;;  %s1336_s2 = inlined_call_operand.vmem [shape: f32[8,8], index: 2, kind: input, shape index: {}]   ;;  %s1337_s3 = inlined_call_operand.vmem [shape: f32[8,1], index: 3, kind: input, shape index: {}]   ;;  %s1338_s4 = inlined_call_operand.vmem [shape: f32[8,1], index: 4, kind: input, shape index: {}]   ;;  %s1339_s5 = inlined_call_operand.vmem [shape: f32[8,1], index: 5, kind: input, shape index: {}]   ;;  %s1340_s6 = inlined_call_operand.hbm [shape: f32[1,128], index: 6, kind: output, shape index: {}]  }
   0x1   :  { %13 = vsyncpa [#allocation4 + $0x1], 0 }
   0x2   :  { %14 = vsyncpa [#allocation5], 0  ;;  %s1115_s21 = smov 0   ;;  %s1117_s22 = smov 0  }
   0x3   :  { %s1119_s23 = smov 0   ;;  %s1121_s24 = smov 0  }
   0x4   :  { %s1123_s25 = smov 0   ;;  %s1125_s26 = smov 0  }
   0x5 LB: > { %s815_s27 = sadd.s32 4294967295, %s1069_s26   ;;  %s29_s28 = sadd.s32 1, %s1065_s25  ;;  %s1069_s26 = sphi %s1125_s26, %s20_s26   ;;  %s1065_s25 = sphi %s1123_s25, %s1349_s25   ;;  %s1061_s24 = sphi %s1121_s24, %s1348_s24   ;;  %s1057_s23 = sphi %s1119_s23, %s1347_s23   ;;  %s1053_s22 = sphi %s1117_s22, %s1346_s22   ;;  %s1049_s21 = sphi %s1115_s21, %s1345_s21  }
   0x6   : > { %p30_p0 = scmp.ge.s32.totalorder %s29_s28, 2  ;;  %s41_s29 = sadd.s32 1, %s1057_s23 }
   0x7   : > { %p48_p1 = scmp.ne.s32.totalorder %s1057_s23, %s1053_s22  ;;  %p49_p2 = scmp.eq.s32.totalorder %s1069_s26, 0 }
   0x8   : > { %s1351_s28 = smov (%p30_p0, %s29_s28), 0  ;;  %p54_p4 = scmp.ne.s32.totalorder %s1053_s22, %s1049_s21 }
   0x9   : > { %p1151_p3 = por %p49_p2, %p48_p1  ;;  %s36_s7 = ssub.s32 %s1065_s25, %s1351_s28 }
   0xa   : > { %p55_p5 = scmp.eq.s32.totalorder %s815_s27, 0  ;;  %p39_p6 = scmp.eq.s32.totalorder %s36_s7, 0 }
   0xb   : > { %p877_p8 = scmp.lt.s32.totalorder %s1069_s26, 2  ;;  %s232_s10 = sand.u32 1, %s1057_s23  }
   0xc   : > { %p1160_p7 = por %p55_p5, %p54_p4  ;;  %s838_s11 = sshll.u32 %s1065_s25, 9 }
   0xd   : > { %s1166_s9 = scalar_select %p39_p6, %s1057_s23, %s41_s29  }
   0xe   : > { %s819_s12 = sshll.u32 %s232_s10, 5  ;;  %s1173_s15 = scalar_lea.hbm %s1334_s0, %s838_s11 }
   0xf   : > { %s236_s16 = scalar_lea.vmem [#allocation3], %s819_s12  ;;  %p1177_p9 = pnand %p877_p8, %p1151_p3 }
  0x10   : > { %s244_s17 = sshll.u32 %s236_s16, 4  ;;  %s1183_s19 = scalar_lea.sflag [#allocation4], %s232_s10  ;;  %s1181_s17 = int_to_ptr.vmem [resolvable:$true] %s244_s17 }
  0x11   : > { %s959_s20 = scalar_lea.hbm %s1173_s15, 512  ;;  %p961_p11 = pneg %p1177_p9 }
  0x12   : > { %p960_p10 = scmp.ne.s32.totalorder %s1173_s15, %s959_s20  ;;  %s964_s30 = scalar_lea.hbm %s1334_s0, 1024 }
  0x13   : > { %p965_p0 = scmp.lt.u32.totalorder %s1173_s15, %s1334_s0  ;;  %p966_p1 = scmp.lt.u32.totalorder %s964_s30, %s959_s20 }
  0x14   : > { %p962_p12 = pnand %p961_p11, %p960_p10  ;;  %p968_p3 = scmp.lt.u32.totalorder %s959_s20, %s1173_s15 }
  0x15   : > { %p967_p2 = por %p966_p1, %p965_p0 }
  0x16   : > { %p963_p13 = pneg %p962_p12 }
  0x17   : > { %p969_p4 = por %p968_p3, %p967_p2 }
  0x19   : > { %p970_p5 = pnand %p969_p4, %p963_p13 }
  0x1b   : > { %973 = shalt.err (!%p970_p5)
}
  0x1c   : > { %s974_s10 = scalar_lea.vmem %s1181_s17, 512  ;;  %s1071_s12 = smov [#allocation3]  }
  0x1d   : > { %p975_p6 = scmp.ne.s32.totalorder %s1181_s17, %s974_s10  ;;  %s979_s13 = sshll.u32 %s1071_s12, 4  ;;  %s980_s13 = int_to_ptr.vmem [resolvable:$false] %s979_s13 }
  0x1e   : > { %s981_s14 = scalar_lea.vmem %s980_s13, 1024  ;;  %p982_p12 = scmp.lt.s32.totalorder %s1181_s17, %s980_s13 }
  0x1f   : > { %p977_p8 = pnand %p975_p6, %p961_p11  ;;  %p983_p0 = scmp.lt.s32.totalorder %s981_s14, %s974_s10 }
  0x21   : > { %p978_p10 = pneg %p977_p8  ;;  %p984_p1 = por %p983_p0, %p982_p12 }
  0x23   : > { %p985_p2 = pnand %p984_p1, %p978_p10 }
  0x25   : > { %988 = shalt.err (!%p985_p2)
}
  0x26   : > { %s1072_s16 = smov 128   ;;  %s1073_s20 = smov 8  }
  0x27   : > { %876 = dma.hbm_to_vmem [thread:$0]  (!%p1177_p9), %s1173_s15, 512, %s1181_s17, %s1183_s19, %s1072_s16, %s1072_s16, %s1073_s20  }
  0x28   : > { %p822_p11 = scmp.ge.s32.totalorder %s1069_s26, 1  ;;  %p252_p13 = scmp.lt.s32.totalorder %s1069_s26, 3 }
  0x2a   : > { %p253_p3 = pnand %p822_p11, %p252_p13 }
  0x2b   : > { %s258_s21 = sand.u32 (!%p253_p3), 1, %s1053_s22  }
  0x2c   : > { %256 = sbr.rel (%p253_p3) target bundleno = 1297 (0x511), region = 44  ;;  %s823_s29 = sshll.u32 (!%p253_p3), %s258_s21, 5 }
  0x2d   : > { %s259_s30 = scalar_lea.sflag (!%p253_p3), [#allocation4], %s258_s21  ;;  %s1214_s7 = scalar_lea.vmem (!%p253_p3), [#allocation3], %s823_s29 }
  0x33   : > { %1040 = dma.done.wait (%p1160_p7), %s259_s30, 512  }
  0x34   : > { %1042 = vsyncadd (%p1160_p7), %s259_s30, 4294966784  ;;  %p824_p4 = scmp.ne.s32.totalorder %s1061_s24, 0 }
  0x35   : > { %v297_v0 = vld [vmem:[%s1339_s5] sm:$0xff] (!%p824_p4)  ;;  %v1074_v1 = vmov (!%p824_p4), 0  }
  0x36   : > { %296 = sbr.rel (%p824_p4) target bundleno = 184 (0xb8), region = 52  ;;  %936 = vset.pattern.permute.xlu0 (!%p824_p4), %v1074_v1 }
  0x37   : > { %300 = vperm.xlu0 (!%p824_p4), %936, %v297_v0  }
  0xb6   : > { %v301_v2 = vpop.permute.xlu0 %300 }
  0xb7   : > { %303 = vst [vmem:[#allocation2] sm:$0xff] %v301_v2 }
  0xb8 PF: > { %v1075_v4 = vmov 0.0   ;;  %vm1076_vm0 = vmmov 0   ;;  %s1228_s8 = sshll.u32 %s1061_s24, 2  ;;  %v306_v6 = vld [vmem:[%s1337_s3] sm:$0xff]  ;;  %v1077_v7 = vmov 0   ;;  %vm325_vm4 = vcmask 64512  }
  0xb9   : > { %847 = vmatprep.subr.mxu0 %v1075_v4  ;;  %849 = vmatprep.mubr.msk.f32.mxu0 %vm1076_vm0, %v1075_v4  ;;  %s498_s11 = sadd.s32 1, %s1228_s8  ;;  %s594_s10 = sadd.s32 2, %s1228_s8  ;;  %v304_v11 = vld [vmem:[%s1335_s1] sm:$0x1]  ;;  %v406_v24 = vlaneseq  ;;  %v403_v25 = vstv %s1228_s8  ;;  %v314_v29 = vld [vmem:[%s1214_s7] sm:$0xff]  ;;  %v827_v44 = vld [vmem:[%s1214_s7 + $0x8] sm:$0xff] }
  0xba   : > { %937 = vset.pattern.permute.xlu0 %v1077_v7  ;;  %852 = vmatprep.subr.mxu1 %v1075_v4  ;;  %v499_v9 = vstv %s498_s11  ;;  %v595_v10 = vstv %s594_s10  ;;  %s690_s12 = sadd.s32 3, %s1228_s8  ;;  %v1249_v22 = vld [vmem:[%s1336_s2] sm:$0xff]  ;;  %vm404_vm5 = vcmp.lt.s32.totalorder %v403_v25, %v304_v11  ;;  %v829_v63 = vld [vmem:[%s1214_s7 + $0x10] sm:$0xff]  ;;  %p833_p7 = scmp.ne.s32.totalorder %s1061_s24, 1 }
  0xbb   : > { %309 = vperm.xlu0 %937, %v306_v6   ;;  %854 = vmatprep.mubr.msk.f32.mxu1 %vm1076_vm0, %v1075_v4  ;;  %v691_v12 = vstv %s690_s12  ;;  %vm500_vm1 = vcmp.lt.s32.totalorder %v499_v9, %v304_v11  ;;  %vm596_vm2 = vcmp.lt.s32.totalorder %v595_v10, %v304_v11  ;;  %v407_v27 = vshrl.u32 %v406_v24, 7 }
  0xbc   : > { %v501_v14 = vsel %vm500_vm1, 1, %v1077_v7  ;;  %v1242_v15 = vsel %vm596_vm2, 1, %v1077_v7  ;;  %vm692_vm3 = vcmp.lt.s32.totalorder %v691_v12, %v304_v11  ;;  %v405_v32 = vsel %vm404_vm5, 1, %v1077_v7 }
  0xbd   : > { %v1244_v17 = vsel %vm692_vm3, 1, %v1077_v7  ;;  %v1260_v31 = vsub.s32 0, %v407_v27 }
  0xbe   : > { %v313_v3 = vld [vmem:[#allocation2] sm:$0xff] }
  0xbf   : > { %v316_v5 = vrot.slane %v313_v3, 4  ;;  %v409_v34 = vrot.slane %v405_v32, %v1260_v31  ;;  %v505_v54 = vrot.slane %v501_v14, %v1260_v31  ;;  %v601_v9 = vrot.slane %v1242_v15, %v1260_v31 }
  0xc0   : > { %v697_v32 = vrot.slane %v1244_v17, %v1260_v31 }
  0xc1   : > { %v317_v8 = vmax.f32 %v313_v3, %v316_v5  ;;  %vm410_vm6 = vcmp.eq.s32.totalorder %v409_v34, 1  ;;  %vm506_vm7 = vcmp.eq.s32.totalorder %v505_v54, 1  ;;  %vm602_vm8 = vcmp.eq.s32.totalorder %v601_v9, 1 }
  0xc2   : > { %vm698_vm9 = vcmp.eq.s32.totalorder %v697_v32, 1 }
  0xc3   : > { %v318_v13 = vrot.slane %v317_v8, 2 }
  0xc5   : > { %v319_v16 = vmax.f32 %v317_v8, %v318_v13 }
  0xc7   : > { %v320_v18 = vrot.slane %v319_v16, 1 }
  0xc9   : > { %v321_v19 = vmax.f32 %v319_v16, %v320_v18 }
  0xcb   : > { %v322_v20 = vsub.f32 %v313_v3, %v321_v19 }
  0xcd   : > { %v323_v21 = vmul.f32 1.442695, %v322_v20  ;;  %v831_v20 = vld [vmem:[%s1214_s7 + $0x18] sm:$0xff] }
  0xcf   : > { %938 = vpow2.f32 %v323_v21 }
  0xd9   : > { %v939_v23 = vpop.eup %938 }
  0xda   : > { %848 = vmatpush3.msra.mxu0 %v939_v23 }
  0xdb   : > { %850 = vmatmul.mubr.msk.f32.vlgmr.msra.gmra.mrb[0].mxu0 %vm325_vm4, %v1249_v22  ;;  %857 = vmatprep.subr.mxu0 %v1075_v4 }
  0xdc   : > { %859 = vmatprep.mubr.msk.f32.mxu0 %vm1076_vm0, %v1075_v4 }
 0x13a   : > { %v1258_v30 = vpop.permute.xlu0 %309 }
 0x13b   : > { %v315_v33 = vadd.f32 %v314_v29, %v1258_v30  ;;  %v414_v46 = vadd.f32 %v827_v44, %v1258_v30  ;;  %v510_v1 = vadd.f32 %v829_v63, %v1258_v30  ;;  %v606_v23 = vadd.f32 %v831_v20, %v1258_v30 }
 0x13d   : > { %v399_v35 = vadd.f32 %v321_v19, %v315_v33 }
 0x1ae   : > { %v395_v26 = vpop.f32.mrb[0].mxu0 }
 0x1af   : > { %940 = vlog2.f32 %v395_v26  ;;  %v851_v28 = vpop.f32.mrb[1].mxu0 }
 0x1b9   : > { %v941_v36 = vpop.eup %940 }
 0x1ba   : > { %v401_v37 = vmul.f32 0.6931472, %v941_v36  ;;  %v705_v36 = vld [vmem:[%s1338_s4] sm:$0xff] (!%p833_p7) }
 0x1bc   : > { %v402_v38 = vadd.f32 %v401_v37, %v399_v35 }
 0x1be   : > { %v411_v39 = vsel %vm410_vm6, %v402_v38, %v313_v3 }
 0x1bf   : > { %v415_v40 = vrot.slane %v411_v39, 4 }
 0x1c1   : > { %v416_v41 = vmax.f32 %v411_v39, %v415_v40 }
 0x1c3   : > { %v417_v42 = vrot.slane %v416_v41, 2 }
 0x1c5   : > { %v418_v43 = vmax.f32 %v416_v41, %v417_v42 }
 0x1c7   : > { %v419_v45 = vrot.slane %v418_v43, 1 }
 0x1c9   : > { %v420_v47 = vmax.f32 %v418_v43, %v419_v45 }
 0x1cb   : > { %v421_v48 = vsub.f32 %v411_v39, %v420_v47  ;;  %v494_v49 = vadd.f32 %v420_v47, %v414_v46 }
 0x1cd   : > { %v422_v50 = vmul.f32 1.442695, %v421_v48 }
 0x1cf   : > { %942 = vpow2.f32 %v422_v50 }
 0x1d9   : > { %v943_v51 = vpop.eup %942 }
 0x1da   : > { %853 = vmatpush3.msra.mxu1 %v943_v51 }
 0x1db   : > { %855 = vmatmul.mubr.msk.f32.vlgmr.msra.gmra.mrb[0].mxu1 %vm325_vm4, %v1249_v22  ;;  %862 = vmatprep.subr.mxu1 %v1075_v4 }
 0x1dc   : > { %864 = vmatprep.mubr.msk.f32.mxu1 %vm1076_vm0, %v1075_v4 }
 0x2ae   : > { %v490_v52 = vpop.f32.mrb[0].mxu1 }
 0x2af   : > { %944 = vlog2.f32 %v490_v52  ;;  %v856_v53 = vpop.f32.mrb[1].mxu1 }
 0x2b9   : > { %v945_v55 = vpop.eup %944 }
 0x2ba   : > { %v496_v56 = vmul.f32 0.6931472, %v945_v55 }
 0x2bc   : > { %v497_v57 = vadd.f32 %v496_v56, %v494_v49 }
 0x2be   : > { %v507_v58 = vsel %vm506_vm7, %v497_v57, %v411_v39 }
 0x2bf   : > { %v511_v59 = vrot.slane %v507_v58, 4 }
 0x2c1   : > { %v512_v60 = vmax.f32 %v507_v58, %v511_v59 }
 0x2c3   : > { %v513_v61 = vrot.slane %v512_v60, 2 }
 0x2c5   : > { %v514_v62 = vmax.f32 %v512_v60, %v513_v61 }
 0x2c7   : > { %v515_v0 = vrot.slane %v514_v62, 1 }
 0x2c9   : > { %v516_v2 = vmax.f32 %v514_v62, %v515_v0 }
 0x2cb   : > { %v517_v3 = vsub.f32 %v507_v58, %v516_v2  ;;  %v590_v4 = vadd.f32 %v516_v2, %v510_v1 }
 0x2cd   : > { %v518_v5 = vmul.f32 1.442695, %v517_v3 }
 0x2cf   : > { %946 = vpow2.f32 %v518_v5 }
 0x2d9   : > { %v947_v6 = vpop.eup %946 }
 0x2da   : > { %858 = vmatpush3.msra.mxu0 %v947_v6 }
 0x2db   : > { %860 = vmatmul.mubr.msk.f32.vlgmr.msra.gmra.mrb[2].mxu0 %vm325_vm4, %v1249_v22 }
 0x3ae   : > { %v586_v7 = vpop.f32.mrb[2].mxu0 }
 0x3af   : > { %948 = vlog2.f32 %v586_v7  ;;  %v861_v8 = vpop.f32.mrb[3].mxu0 }
 0x3b9   : > { %v949_v10 = vpop.eup %948 }
 0x3ba   : > { %v592_v11 = vmul.f32 0.6931472, %v949_v10 }
 0x3bc   : > { %v593_v12 = vadd.f32 %v592_v11, %v590_v4 }
 0x3be   : > { %v603_v13 = vsel %vm602_vm8, %v593_v12, %v507_v58 }
 0x3bf   : > { %v607_v14 = vrot.slane %v603_v13, 4 }
 0x3c1   : > { %v608_v16 = vmax.f32 %v603_v13, %v607_v14 }
 0x3c3   : > { %v609_v18 = vrot.slane %v608_v16, 2 }
 0x3c5   : > { %v610_v19 = vmax.f32 %v608_v16, %v609_v18 }
 0x3c7   : > { %v611_v21 = vrot.slane %v610_v19, 1 }
 0x3c9   : > { %v612_v24 = vmax.f32 %v610_v19, %v611_v21 }
 0x3cb   : > { %v613_v25 = vsub.f32 %v603_v13, %v612_v24  ;;  %v686_v26 = vadd.f32 %v612_v24, %v606_v23 }
 0x3cd   : > { %v614_v27 = vmul.f32 1.442695, %v613_v25 }
 0x3cf   : > { %950 = vpow2.f32 %v614_v27 }
 0x3d9   : > { %v951_v28 = vpop.eup %950 }
 0x3da   : > { %863 = vmatpush3.msra.mxu1 %v951_v28 }
 0x3db   : > { %865 = vmatmul.mubr.msk.f32.vlgmr.msra.gmra.mrb[2].mxu1 %vm325_vm4, %v1249_v22  ;;  %v1078_v22 = vmov (!%p833_p7), 0  }
 0x3dc   : > { %954 = vset.pattern.permute.xlu0 (!%p833_p7), %v1078_v22 }
 0x3dd   : > { %708 = vperm.xlu0 (!%p833_p7), %954, %v705_v36  }
 0x45c   : > { %v709_v37 = vpop.permute.xlu0 (!%p833_p7), %708 }
 0x4ae   : > { %v682_v15 = vpop.f32.mrb[2].mxu1 }
 0x4af   : > { %952 = vlog2.f32 %v682_v15  ;;  %v866_v29 = vpop.f32.mrb[3].mxu1 }
 0x4b9   : > { %v953_v33 = vpop.eup %952  ;;  %704 = sbr.rel (%p833_p7) target bundleno = 1272 (0x4f8), region = 56 }
 0x4ba   : > { %v688_v34 = vmul.f32 0.6931472, %v953_v33 }
 0x4bc   : > { %v689_v30 = vadd.f32 %v688_v34, %v686_v26 }
 0x4be   : > { %v699_v35 = vsel %vm698_vm9, %v689_v30, %v603_v13 }
 0x4bf   : > { %700 = vst [vmem:[#allocation2] sm:$0xff] %v699_v35  ;;  %v711_v38 = vadd.f32 (!%p833_p7), %v709_v37, %v699_v35 }
 0x4c1   : > { %v712_v39 = vrot.slane %v711_v38, 4 }
 0x4c3   : > { %v713_v17 = vmax.f32 %v711_v38, %v712_v39 }
 0x4c5   : > { %v714_v31 = vrot.slane %v713_v17, 2 }
 0x4c7   : > { %v715_v40 = vmax.f32 %v713_v17, %v714_v31 }
 0x4c9   : > { %v716_v41 = vrot.slane %v715_v40, 1 }
 0x4cb   : > { %v717_v42 = vmax.f32 %v715_v40, %v716_v41 }
 0x4cd   : > { %v718_v43 = vsub.f32 %v711_v38, %v717_v42 }
 0x4cf   : > { %v719_v44 = vmul.f32 1.442695, %v718_v43 }
 0x4d1   : > { %955 = vpow2.f32 %v719_v44 }
 0x4db   : > { %v956_v45 = vpop.eup %955 }
 0x4dc   : > { %v721_v46 = vrot.slane %v956_v45, 4 }
 0x4de   : > { %v722_v47 = vadd.f32 %v956_v45, %v721_v46 }
 0x4e0   : > { %v723_v48 = vrot.slane %v722_v47, 2 }
 0x4e2   : > { %v724_v49 = vadd.f32 %v723_v48, %v722_v47 }
 0x4e4   : > { %v725_v50 = vrot.slane %v724_v49, 1 }
 0x4e6   : > { %v726_v51 = vadd.f32 %v725_v50, %v724_v49 }
 0x4e8   : > { %957 = vlog2.f32 %v726_v51 }
 0x4f2   : > { %v958_v52 = vpop.eup %957 }
 0x4f3   : > { %v728_v53 = vmul.f32 0.6931472, %v958_v52 }
 0x4f5   : > { %v729_v54 = vadd.f32 %v728_v53, %v717_v42 }
 0x4f7   : > { %730 = vst [vmem:[#allocation6] sm:$0x1] %v729_v54 }
 0x4f8 PF: > { %p1290_p9 = scmp.eq.s32.totalorder %s815_s27, 1  ;;  %s1079_s30 = smov [#allocation6]  }
 0x4f9   : > { %s740_s7 = sshll.u32 %s1079_s30, 4  ;;  %s741_s7 = int_to_ptr.vmem [resolvable:$true] %s740_s7 }
 0x4fa   : > { %s989_s15 = scalar_lea.vmem %s741_s7, 16  ;;  %s995_s17 = scalar_lea.vmem %s741_s7, 32 }
 0x4fb   : > { %p990_p5 = scmp.ne.s32.totalorder %s741_s7, %s989_s15  ;;  %p996_p10 = scmp.lt.s32.totalorder %s741_s7, %s741_s7 }
 0x4fc   : > { %p997_p12 = scmp.lt.s32.totalorder %s995_s17, %s989_s15 }
 0x4fd   : > { %p991_p6 = pnand %p990_p5, %p1290_p9 }
 0x4fe   : > { %p998_p0 = por %p997_p12, %p996_p10 }
 0x4ff   : > { %p992_p8 = pneg %p991_p6 }
 0x501   : > { %p999_p1 = pnand %p998_p0, %p992_p8 }
 0x503   : > { %1002 = shalt.err (!%p999_p1)
}
 0x504   : > { %s1003_s18 = scalar_lea.hbm %s1340_s6, 16 }
 0x505   : > { %p1004_p2 = scmp.ne.s32.totalorder %s1340_s6, %s1003_s18  ;;  %p1009_p3 = scmp.lt.u32.totalorder %s1003_s18, %s1340_s6 }
 0x507   : > { %p1005_p11 = pnand %p1004_p2, %p1290_p9 }
 0x509   : > { %p1006_p13 = pneg %p1005_p11 }
 0x50b   : > { %p1011_p4 = pnand %p1009_p3, %p1006_p13 }
 0x50d   : > { %1014 = shalt.err (!%p1011_p4)
}
 0x50e   : > { %870 = dma.vmem_to_hbm [thread:$0]  (%p1290_p9), %s741_s7, 16, %s1340_s6, [#allocation5]  }
 0x50f   : > { %1044 = dma.done.wait (%p1290_p9), [#allocation5], 16  }
 0x510   : > { %1046 = vsyncadd (%p1290_p9), [#allocation5], 4294967280 }
 0x511 PF: > { %s20_s26 = sadd.s32 1, %s1069_s26   ;;  %s1345_s21 = smov %s1053_s22 }
 0x512   : > { %p17_p7 = scmp.ge.s32.totalorder %s20_s26, 4   ;;  %s1346_s22 = smov %s1057_s23 }
 0x513   : > { %s1347_s23 = smov %s1166_s9  ;;  %s1348_s24 = smov %s1065_s25 }
 0x514   : > { %s1349_s25 = smov %s1351_s28  ;;  %19 = sbr.rel (!%p17_p7) target bundleno = 5 (0x5), region = 96 }
 0x51b   :  { %753 = vsyncpa [#allocation4], 1 }
 0x51c   :  { %755 = vsyncpa [#allocation4 + $0x1], 1 }
 0x51d   :  { %756 = vsyncpa [#allocation5], 1 }
 0x51e   :  { %758 = vsyncpa [#allocation5 + $0x1], 1 }

</bundles_post_ra>
